<compile_context>
chip_gen: v7x
topology: tpu7x:2x2x1
jax: 0.10.0
libtpu: 0.0.40
codegen_flags: <defaults>
</compile_context>

<pallas_src>
import functools

import jax
import jax.numpy as jnp
from jax import lax
from jax.experimental import pallas as pl
from jax.experimental.pallas import tpu as pltpu


# --------------------------- device-aware knobs -----------------------------

def _device_knobs():
    """Tile / VMEM knobs per TPU generation (conservative fallback = v7x)."""
    try:
        kind = jax.devices()[0].device_kind.lower()
    except Exception:  # pragma: no cover - defensive
        kind = ""
    if ("v4" in kind) or ("v5" in kind) or ("v6" in kind):
        # 128 MiB physical VMEM: bigger row tiles amortize the ~0.35 us
        # per-grid-step overhead; raise the scoped limit accordingly.
        return {"row_tile_cap": 2048, "tq_cap": 256, "tkv_cap": 1024,
                "vmem_limit": 100 * 1024 * 1024}
    # v7x (64 MiB VMEM) or unknown: tighter tiles, conservative scoped limit.
    return {"row_tile_cap": 512, "tq_cap": 128, "tkv_cap": 512,
            "vmem_limit": 32 * 1024 * 1024}


def _tile(m, cap):
    # Full extent if it fits (block == full dim is always legal), else the
    # cap (all caps are multiples of 8, satisfying the sublane rule).
    return m if m <= cap else cap


# ---------------- fused SR-conv + LayerNorm + K/V projection ----------------

def _sr_ln_kv_kernel(p_ref, srw_ref, srb_ref, g_ref, bb_ref, kw_ref, vw_ref,
                     k_ref, v_ref, *, eps):
    # SR "conv" as a patch matmul (bf16 operands, fp32 accumulation) + bias.
    y = jnp.dot(p_ref[...], srw_ref[...],
                preferred_element_type=jnp.float32) + srb_ref[...]
    # LayerNorm over channels; statistics stay fp32.
    mu = jnp.mean(y, axis=-1, keepdims=True)
    var = jnp.mean((y - mu) ** 2, axis=-1, keepdims=True)
    xs = ((y - mu) * lax.rsqrt(var + eps) * g_ref[...] + bb_ref[...]
          ).astype(jnp.bfloat16)
    # K / V projections straight from VMEM (no HBM round trip of xs).
    k_ref[...] = jnp.dot(xs, kw_ref[...],
                         preferred_element_type=jnp.float32).astype(k_ref.dtype)
    v_ref[...] = jnp.dot(xs, vw_ref[...],
                         preferred_element_type=jnp.float32).astype(v_ref.dtype)


def sr_ln_kv_project(patches, sr_w, sr_b, ln_g, ln_b, k_w, v_w, *, knobs,
                     eps=1e-5):
    """patches: (M, sr*sr*C) bf16 -> (k, v), each (M, D) bf16."""
    m, kk = patches.shape
    c = sr_w.shape[1]
    d = k_w.shape[1]
    tm = _tile(m, knobs["row_tile_cap"])
    return pl.pallas_call(
        functools.partial(_sr_ln_kv_kernel, eps=eps),
        out_shape=(jax.ShapeDtypeStruct((m, d), jnp.bfloat16),
                   jax.ShapeDtypeStruct((m, d), jnp.bfloat16)),
        grid=(pl.cdiv(m, tm),),
        in_specs=[
            pl.BlockSpec((tm, kk), lambda i: (i, 0)),
            pl.BlockSpec((kk, c), lambda i: (0, 0)),
            pl.BlockSpec((1, c), lambda i: (0, 0)),
            pl.BlockSpec((1, c), lambda i: (0, 0)),
            pl.BlockSpec((1, c), lambda i: (0, 0)),
            pl.BlockSpec((c, d), lambda i: (0, 0)),
            pl.BlockSpec((c, d), lambda i: (0, 0)),
        ],
        out_specs=(pl.BlockSpec((tm, d), lambda i: (i, 0)),
                   pl.BlockSpec((tm, d), lambda i: (i, 0))),
        compiler_params=pltpu.CompilerParams(
            dimension_semantics=("parallel",),
            vmem_limit_bytes=knobs["vmem_limit"]),
    )(patches, sr_w, sr_b.reshape(1, c), ln_g.reshape(1, c),
      ln_b.reshape(1, c), k_w, v_w)


# --------------------- fused K/V projection (sr_ratio == 1) -----------------

def _kv_kernel(x_ref, kw_ref, vw_ref, k_ref, v_ref):
    x = x_ref[...]                                   # bf16, shared read
    k_ref[...] = jnp.dot(x, kw_ref[...],
                         preferred_element_type=jnp.float32).astype(k_ref.dtype)
    v_ref[...] = jnp.dot(x, vw_ref[...],
                         preferred_element_type=jnp.float32).astype(v_ref.dtype)


def kv_project(xs, k_w, v_w, *, knobs):
    """xs: (M, C) bf16 -> (k, v), each (M, D) bf16 (qkv_bias=False path)."""
    m, c = xs.shape
    d = k_w.shape[1]
    tm = _tile(m, knobs["row_tile_cap"])
    return pl.pallas_call(
        _kv_kernel,
        out_shape=(jax.ShapeDtypeStruct((m, d), jnp.bfloat16),
                   jax.ShapeDtypeStruct((m, d), jnp.bfloat16)),
        grid=(pl.cdiv(m, tm),),
        in_specs=[
            pl.BlockSpec((tm, c), lambda i: (i, 0)),
            pl.BlockSpec((c, d), lambda i: (0, 0)),
            pl.BlockSpec((c, d), lambda i: (0, 0)),
        ],
        out_specs=(pl.BlockSpec((tm, d), lambda i: (i, 0)),
                   pl.BlockSpec((tm, d), lambda i: (i, 0))),
        compiler_params=pltpu.CompilerParams(
            dimension_semantics=("parallel",),
            vmem_limit_bytes=knobs["vmem_limit"]),
    )(xs, k_w, v_w)


# ------------- fused q-proj + online-softmax attention + out-proj ------------

def _attn_kernel(x_ref, k_ref, v_ref, qw_ref, pw_ref, pb_ref, o_ref,
                 q_sc, m_sc, l_sc, acc_sc, *,
                 num_heads, head_dim, ns_total, tkv):
    kv = pl.program_id(2)
    last_kv = pl.num_programs(2) - 1

    @pl.when(kv == 0)
    def _():
        # q projection once per (batch, q-tile); softmax scale is pre-folded
        # into the bf16 q weight.  x_ref is not re-fetched across kv steps.
        q_sc[...] = jnp.dot(x_ref[...], qw_ref[...],
                            preferred_element_type=jnp.float32
                            ).astype(jnp.bfloat16)
        m_sc[...] = jnp.full(m_sc.shape, -jnp.inf, dtype=m_sc.dtype)
        l_sc[...] = jnp.zeros(l_sc.shape, dtype=l_sc.dtype)
        acc_sc[...] = jnp.zeros(acc_sc.shape, dtype=acc_sc.dtype)

    k = k_ref[...]                                   # (TKV, D) bf16
    v = v_ref[...]

    ragged = (ns_total % tkv) != 0
    if ragged:
        col = kv * tkv + lax.broadcasted_iota(jnp.int32, (1, tkv), 1)
        col_valid = col < ns_total                   # mask padded KV rows

    for h in range(num_heads):                       # static unroll
        lo, hi = h * head_dim, (h + 1) * head_dim
        # scores contract the last dims directly (no in-kernel k transpose)
        s = lax.dot_general(q_sc[:, lo:hi], k[:, lo:hi],
                            (((1,), (1,)), ((), ())),
                            preferred_element_type=jnp.float32)   # (TQ, TKV)
        if ragged:
            s = jnp.where(col_valid, s, -jnp.inf)
        m_prev = m_sc[:, h:h + 1]
        m_new = jnp.maximum(m_prev, jnp.max(s, axis=-1, keepdims=True))
        alpha = jnp.exp(m_prev - m_new)
        p = jnp.exp(s - m_new)                       # unnormalized probs
        l_sc[:, h:h + 1] = alpha * l_sc[:, h:h + 1] + \
            jnp.sum(p, axis=-1, keepdims=True)
        # normalization is deferred until after P@V (post-PV divide).
        acc_sc[:, lo:hi] = alpha * acc_sc[:, lo:hi] + jnp.dot(
            p.astype(jnp.bfloat16), v[:, lo:hi],
            preferred_element_type=jnp.float32)
        m_sc[:, h:h + 1] = m_new

    @pl.when(kv == last_kv)
    def _():
        # Post-P@V softmax normalization: TQ*head_dim muls per head instead of
        # TQ*Ns; reciprocal runs on the EUP (free slot).
        for h in range(num_heads):
            lo, hi = h * head_dim, (h + 1) * head_dim
            acc_sc[:, lo:hi] = acc_sc[:, lo:hi] * pl.reciprocal(
                l_sc[:, h:h + 1], approx=True)
        # Head "concat" is implicit in the accumulator layout: one full-D
        # output projection on the MXU + bias, lane-dense store.
        out = jnp.dot(acc_sc[...].astype(jnp.bfloat16), pw_ref[...],
                      preferred_element_type=jnp.float32) + pb_ref[...]
        o_ref[...] = out.astype(o_ref.dtype)


def fused_attention(x, k, v, qw_scaled, proj_w, proj_b, *, num_heads, knobs,
                    out_dtype=jnp.float32):
    """x: (B, N, C) bf16; k, v: (B, Ns, D) bf16 -> (B, N, D) out_dtype."""
    b, n, c = x.shape
    _, ns, d = k.shape
    hd = d // num_heads
    tq = _tile(n, knobs["tq_cap"])
    tkv = _tile(ns, knobs["tkv_cap"])
    kernel = functools.partial(_attn_kernel, num_heads=num_heads,
                               head_dim=hd, ns_total=ns, tkv=tkv)
    return pl.pallas_call(
        kernel,
        out_shape=jax.ShapeDtypeStruct((b, n, d), out_dtype),
        grid=(b, pl.cdiv(n, tq), pl.cdiv(ns, tkv)),
        in_specs=[
            pl.BlockSpec((pl.Squeezed(), tq, c),
                         lambda bi, qi, ki: (bi, qi, 0)),
            pl.BlockSpec((pl.Squeezed(), tkv, d),
                         lambda bi, qi, ki: (bi, ki, 0)),
            pl.BlockSpec((pl.Squeezed(), tkv, d),
                         lambda bi, qi, ki: (bi, ki, 0)),
            pl.BlockSpec((c, d), lambda bi, qi, ki: (0, 0)),
            pl.BlockSpec((d, d), lambda bi, qi, ki: (0, 0)),
            pl.BlockSpec((1, d), lambda bi, qi, ki: (0, 0)),
        ],
        out_specs=pl.BlockSpec((pl.Squeezed(), tq, d),
                               lambda bi, qi, ki: (bi, qi, 0)),
        scratch_shapes=[
            pltpu.VMEM((tq, d), jnp.bfloat16),        # q (scale pre-folded)
            pltpu.VMEM((tq, num_heads), jnp.float32),  # running max per head
            pltpu.VMEM((tq, num_heads), jnp.float32),  # running sum per head
            pltpu.VMEM((tq, d), jnp.float32),          # unnormalized P@V acc
        ],
        compiler_params=pltpu.CompilerParams(
            dimension_semantics=("parallel", "parallel", "arbitrary"),
            vmem_limit_bytes=knobs["vmem_limit"]),
    )(x, k, v, qw_scaled, proj_w, proj_b.reshape(1, d))


# ----------------------------- module forward -------------------------------

def _extract_patches(x_source, H, W, sr):
    """(B, H*W, C) channels-last -> (B*Hs*Ws, sr*sr*C), (kh, kw, c_in) order."""
    b, _, c = x_source.shape
    hs, ws = H // sr, W // sr
    p = x_source.reshape(b, hs, sr, ws, sr, c)
    p = p.transpose(0, 1, 3, 2, 4, 5)                 # (B, Hs, Ws, sr, sr, C)
    return p.reshape(b * hs * ws, sr * sr * c)


def my_attention_forward(x, x_source, H, W, params, *, num_heads, sr_ratio,
                         scale, out_dtype=jnp.float32):
    B, N, C = x.shape
    dim_out = params["q_w"].shape[1]
    knobs = _device_knobs()

    # One-time weight prep: fold softmax scale into the q weight, cast bf16.
    qw = (params["q_w"] * scale).astype(jnp.bfloat16)
    kw = params["k_w"].astype(jnp.bfloat16)
    vw = params["v_w"].astype(jnp.bfloat16)
    pw = params["proj_w"].astype(jnp.bfloat16)

    # Activations enter the kernels in bf16 (halves the dominant DMA traffic).
    x_bf = x.astype(jnp.bfloat16)
    xs_bf = x_source.astype(jnp.bfloat16)

    if sr_ratio > 1:
        hs, ws = H // sr_ratio, W // sr_ratio
        patches = _extract_patches(xs_bf, H, W, sr_ratio)
        srw = params["sr_w"].astype(jnp.bfloat16)
        k_flat, v_flat = sr_ln_kv_project(
            patches, srw, params["sr_b"], params["ln_g"], params["ln_b"],
            kw, vw, knobs=knobs)
        ns = hs * ws
    else:
        ns = x_source.shape[1]
        k_flat, v_flat = kv_project(xs_bf.reshape(B * ns, C), kw, vw,
                                    knobs=knobs)

    k = k_flat.reshape(B, ns, dim_out)
    v = v_flat.reshape(B, ns, dim_out)

    return fused_attention(x_bf, k, v, qw, pw, params["proj_b"],
                           num_heads=num_heads, knobs=knobs,
                           out_dtype=out_dtype)


# --------------------------- pure-JAX reference ------------------------------

def reference_forward(x, x_source, H, W, params, *, num_heads, sr_ratio, scale):
    hi = jax.lax.Precision.HIGHEST
    B, N, C = x.shape
    dim_out = params["q_w"].shape[1]
    hd = dim_out // num_heads

    q = jnp.einsum("bnc,cd->bnd", x, params["q_w"], precision=hi)
    q = q.reshape(B, N, num_heads, hd).transpose(0, 2, 1, 3)

    xs = x_source
    if sr_ratio > 1:
        sr = sr_ratio
        hs, ws = H // sr, W // sr
        patches = (xs.reshape(B, hs, sr, ws, sr, C)
                     .transpose(0, 1, 3, 2, 4, 5)
                     .reshape(B, hs * ws, sr * sr * C))
        xs = jnp.einsum("bpk,kc->bpc", patches, params["sr_w"],
                        precision=hi) + params["sr_b"]
        mu = jnp.mean(xs, -1, keepdims=True)
        var = jnp.mean((xs - mu) ** 2, -1, keepdims=True)
        xs = (xs - mu) / jnp.sqrt(var + 1e-5) * params["ln_g"] + params["ln_b"]

    Ns = xs.shape[1]
    k = jnp.einsum("bnc,cd->bnd", xs, params["k_w"], precision=hi)
    v = jnp.einsum("bnc,cd->bnd", xs, params["v_w"], precision=hi)
    k = k.reshape(B, Ns, num_heads, hd).transpose(0, 2, 1, 3)
    v = v.reshape(B, Ns, num_heads, hd).transpose(0, 2, 1, 3)

    attn = jnp.einsum("bhnd,bhmd->bhnm", q, k, precision=hi) * scale
    attn = jax.nn.softmax(attn, axis=-1)
    o = jnp.einsum("bhnm,bhmd->bhnd", attn, v, precision=hi)
    o = o.transpose(0, 2, 1, 3).reshape(B, N, dim_out)
    o = jnp.einsum("bnd,de->bne", o, params["proj_w"], precision=hi) \
        + params["proj_b"]
    return o


# ----------------------------------- main ------------------------------------

if __name__ == "__main__":
    B, H, W, C = 2, 8, 8, 32
    dim, dim_out = C, C
    num_heads, sr_ratio = 2, 2
    N = H * W                        # query tokens
    Ns_src = H * W                   # source tokens (pre spatial reduction)
    head_dim = dim // num_heads
    scale = head_dim ** (-0.5)       # qk_scale=None path

    key = jax.random.PRNGKey(0)
    ks = jax.random.split(key, 12)
    std = 0.05
    params = {
        # nn.Linear weights stored as (in, out); qkv_bias=False -> no bias.
        "q_w": std * jax.random.normal(ks[2], (dim, dim_out), jnp.float32),
        "k_w": std * jax.random.normal(ks[3], (dim, dim_out), jnp.float32),
        "v_w": std * jax.random.normal(ks[4], (dim, dim_out), jnp.float32),
        "proj_w": std * jax.random.normal(ks[5], (dim_out, dim_out), jnp.float32),
        "proj_b": std * jax.random.normal(ks[6], (dim_out,), jnp.float32),
        # Conv2d(dim, dim, sr, sr) weight, flattened (kh, kw, c_in) -> c_out.
        "sr_w": std * jax.random.normal(
            ks[7], (dim * sr_ratio * sr_ratio, dim), jnp.float32),
        "sr_b": std * jax.random.normal(ks[8], (dim,), jnp.float32),
        "ln_g": 1.0 + 0.1 * jax.random.normal(ks[9], (dim,), jnp.float32),
        "ln_b": 0.1 * jax.random.normal(ks[10], (dim,), jnp.float32),
    }

    x = jax.random.normal(ks[0], (B, N, C), jnp.float32)
    x_source = jax.random.normal(ks[1], (B, Ns_src, C), jnp.float32)

    out = my_attention_forward(
        x, x_source, H, W, params,
        num_heads=num_heads, sr_ratio=sr_ratio, scale=scale)
    out = jax.block_until_ready(out)

    ref = reference_forward(
        x, x_source, H, W, params,
        num_heads=num_heads, sr_ratio=sr_ratio, scale=scale)

    assert out.shape == (B, N, dim_out), out.shape
    # bf16 MXU operands + fp32 accumulation + approx EUP reciprocal.
    assert jnp.allclose(out, ref, rtol=1e-2, atol=3e-3), (
        float(jnp.max(jnp.abs(out - ref))))
    print("KERNEL_OK")
</pallas_src>

<mosaic_0001>
module attributes {stable_mosaic.version = 11 : i64} {
  func.func @_sr_ln_kv_kernel(%arg0: i32, %arg1: memref<32x128xbf16, #tpu.memory_space<vmem>>, %arg2: memref<128x32xbf16, #tpu.memory_space<vmem>>, %arg3: memref<1x32xf32, #tpu.memory_space<vmem>>, %arg4: memref<1x32xf32, #tpu.memory_space<vmem>>, %arg5: memref<1x32xf32, #tpu.memory_space<vmem>>, %arg6: memref<32x32xbf16, #tpu.memory_space<vmem>>, %arg7: memref<32x32xbf16, #tpu.memory_space<vmem>>, %arg8: memref<32x32xbf16, #tpu.memory_space<vmem>>, %arg9: memref<32x32xbf16, #tpu.memory_space<vmem>>) attributes {dimension_semantics = [#tpu.dimension_semantics<parallel>], iteration_bounds = array<i64: 1>, scalar_prefetch = 0 : i64, scratch_operands = 0 : i64, tpu.core_type = #tpu.core_type<tc>, window_params = [{transform_indices = @transform_0, window_bounds = array<i64: 32, 128>}, {pipeline_mode = #tpu.pipeline_mode<synchronous>, transform_indices = @transform_1, window_bounds = array<i64: 128, 32>}, {pipeline_mode = #tpu.pipeline_mode<synchronous>, transform_indices = @transform_2, window_bounds = array<i64: 1, 32>}, {pipeline_mode = #tpu.pipeline_mode<synchronous>, transform_indices = @transform_3, window_bounds = array<i64: 1, 32>}, {pipeline_mode = #tpu.pipeline_mode<synchronous>, transform_indices = @transform_4, window_bounds = array<i64: 1, 32>}, {pipeline_mode = #tpu.pipeline_mode<synchronous>, transform_indices = @transform_5, window_bounds = array<i64: 32, 32>}, {pipeline_mode = #tpu.pipeline_mode<synchronous>, transform_indices = @transform_6, window_bounds = array<i64: 32, 32>}, {transform_indices = @transform_7, window_bounds = array<i64: 32, 32>}, {transform_indices = @transform_8, window_bounds = array<i64: 32, 32>}]} {
    %c0 = arith.constant 0 : index
    %c0_0 = arith.constant 0 : index
    %0 = vector.load %arg1[%c0, %c0_0] : memref<32x128xbf16, #tpu.memory_space<vmem>>, vector<32x128xbf16>
    %c0_1 = arith.constant 0 : index
    %c0_2 = arith.constant 0 : index
    %1 = vector.load %arg2[%c0_1, %c0_2] : memref<128x32xbf16, #tpu.memory_space<vmem>>, vector<128x32xbf16>
    %cst = arith.constant dense<0.000000e+00> : vector<32x32xf32>
    %2 = tpu.matmul %0, %1, %cst {dimension_numbers = #tpu.dot_dimension_numbers<[1], [0], [0], [1], [0, 0, 1, 1], [], []>} : vector<32x128xbf16>, vector<128x32xbf16>, vector<32x32xf32> -> vector<32x32xf32>
    %c0_3 = arith.constant 0 : index
    %c0_4 = arith.constant 0 : index
    %3 = vector.load %arg3[%c0_3, %c0_4] : memref<1x32xf32, #tpu.memory_space<vmem>>, vector<1x32xf32>
    %4 = vector.broadcast %3 : vector<1x32xf32> to vector<32x32xf32>
    %5 = arith.addf %2, %4 : vector<32x32xf32>
    %cst_5 = arith.constant dense<0.000000e+00> : vector<32xf32>
    %6 = vector.multi_reduction <add>, %5, %cst_5 [1] : vector<32x32xf32> to vector<32xf32>
    %7 = vector.shape_cast %6 : vector<32xf32> to vector<32x1xf32>
    %cst_6 = arith.constant 3.200000e+01 : f32
    %8 = vector.broadcast %cst_6 : f32 to vector<32x1xf32>
    %9 = arith.divf %7, %8 : vector<32x1xf32>
    %10 = vector.broadcast %9 : vector<32x1xf32> to vector<32x32xf32>
    %11 = arith.subf %5, %10 : vector<32x32xf32>
    %12 = arith.mulf %11, %11 : vector<32x32xf32>
    %cst_7 = arith.constant dense<0.000000e+00> : vector<32xf32>
    %13 = vector.multi_reduction <add>, %12, %cst_7 [1] : vector<32x32xf32> to vector<32xf32>
    %14 = vector.shape_cast %13 : vector<32xf32> to vector<32x1xf32>
    %cst_8 = arith.constant 3.200000e+01 : f32
    %15 = vector.broadcast %cst_8 : f32 to vector<32x1xf32>
    %16 = arith.divf %14, %15 : vector<32x1xf32>
    %17 = vector.broadcast %9 : vector<32x1xf32> to vector<32x32xf32>
    %18 = arith.subf %5, %17 : vector<32x32xf32>
    %cst_9 = arith.constant 9.99999974E-6 : f32
    %19 = vector.broadcast %cst_9 : f32 to vector<32x1xf32>
    %20 = arith.addf %16, %19 : vector<32x1xf32>
    %21 = math.rsqrt %20 : vector<32x1xf32>
    %22 = vector.broadcast %21 : vector<32x1xf32> to vector<32x32xf32>
    %23 = arith.mulf %18, %22 : vector<32x32xf32>
    %c0_10 = arith.constant 0 : index
    %c0_11 = arith.constant 0 : index
    %24 = vector.load %arg4[%c0_10, %c0_11] : memref<1x32xf32, #tpu.memory_space<vmem>>, vector<1x32xf32>
    %25 = vector.broadcast %24 : vector<1x32xf32> to vector<32x32xf32>
    %26 = arith.mulf %23, %25 : vector<32x32xf32>
    %c0_12 = arith.constant 0 : index
    %c0_13 = arith.constant 0 : index
    %27 = vector.load %arg5[%c0_12, %c0_13] : memref<1x32xf32, #tpu.memory_space<vmem>>, vector<1x32xf32>
    %28 = vector.broadcast %27 : vector<1x32xf32> to vector<32x32xf32>
    %29 = arith.addf %26, %28 : vector<32x32xf32>
    %30 = arith.truncf %29 : vector<32x32xf32> to vector<32x32xbf16>
    %c0_14 = arith.constant 0 : index
    %c0_15 = arith.constant 0 : index
    %31 = vector.load %arg6[%c0_14, %c0_15] : memref<32x32xbf16, #tpu.memory_space<vmem>>, vector<32x32xbf16>
    %cst_16 = arith.constant dense<0.000000e+00> : vector<32x32xf32>
    %32 = tpu.matmul %30, %31, %cst_16 {dimension_numbers = #tpu.dot_dimension_numbers<[1], [0], [0], [1], [0, 0, 1, 1], [], []>} : vector<32x32xbf16>, vector<32x32xbf16>, vector<32x32xf32> -> vector<32x32xf32>
    %33 = arith.truncf %32 : vector<32x32xf32> to vector<32x32xbf16>
    %c0_17 = arith.constant 0 : index
    %c0_18 = arith.constant 0 : index
    %34 = vector.load %arg8[%c0_17, %c0_18] : memref<32x32xbf16, #tpu.memory_space<vmem>>, vector<32x32xbf16>
    tpu.vector_store %arg8[%c0_17, %c0_18], %33 {strides = array<i32>} : memref<32x32xbf16, #tpu.memory_space<vmem>>, vector<32x32xbf16>,
    %c0_19 = arith.constant 0 : index
    %c0_20 = arith.constant 0 : index
    %35 = vector.load %arg7[%c0_19, %c0_20] : memref<32x32xbf16, #tpu.memory_space<vmem>>, vector<32x32xbf16>
    %cst_21 = arith.constant dense<0.000000e+00> : vector<32x32xf32>
    %36 = tpu.matmul %30, %35, %cst_21 {dimension_numbers = #tpu.dot_dimension_numbers<[1], [0], [0], [1], [0, 0, 1, 1], [], []>} : vector<32x32xbf16>, vector<32x32xbf16>, vector<32x32xf32> -> vector<32x32xf32>
    %37 = arith.truncf %36 : vector<32x32xf32> to vector<32x32xbf16>
    %c0_22 = arith.constant 0 : index
    %c0_23 = arith.constant 0 : index
    %38 = vector.load %arg9[%c0_22, %c0_23] : memref<32x32xbf16, #tpu.memory_space<vmem>>, vector<32x32xbf16>
    tpu.vector_store %arg9[%c0_22, %c0_23], %37 {strides = array<i32>} : memref<32x32xbf16, #tpu.memory_space<vmem>>, vector<32x32xbf16>,
    return
  }
  func.func @transform_0(%arg0: i32) -> (i32, i32) {
    %c0_i32 = arith.constant 0 : i32
    %c0_i32_0 = arith.constant 0 : i32
    return %arg0, %c0_i32 : i32, i32
  }
  func.func @transform_1(%arg0: i32) -> (i32, i32) {
    %c0_i32 = arith.constant 0 : i32
    %c0_i32_0 = arith.constant 0 : i32
    %c0_i32_1 = arith.constant 0 : i32
    return %c0_i32, %c0_i32_0 : i32, i32
  }
  func.func @transform_2(%arg0: i32) -> (i32, i32) {
    %c0_i32 = arith.constant 0 : i32
    %c0_i32_0 = arith.constant 0 : i32
    %c0_i32_1 = arith.constant 0 : i32
    return %c0_i32, %c0_i32_0 : i32, i32
  }
  func.func @transform_3(%arg0: i32) -> (i32, i32) {
    %c0_i32 = arith.constant 0 : i32
    %c0_i32_0 = arith.constant 0 : i32
    %c0_i32_1 = arith.constant 0 : i32
    return %c0_i32, %c0_i32_0 : i32, i32
  }
  func.func @transform_4(%arg0: i32) -> (i32, i32) {
    %c0_i32 = arith.constant 0 : i32
    %c0_i32_0 = arith.constant 0 : i32
    %c0_i32_1 = arith.constant 0 : i32
    return %c0_i32, %c0_i32_0 : i32, i32
  }
  func.func @transform_5(%arg0: i32) -> (i32, i32) {
    %c0_i32 = arith.constant 0 : i32
    %c0_i32_0 = arith.constant 0 : i32
    %c0_i32_1 = arith.constant 0 : i32
    return %c0_i32, %c0_i32_0 : i32, i32
  }
  func.func @transform_6(%arg0: i32) -> (i32, i32) {
    %c0_i32 = arith.constant 0 : i32
    %c0_i32_0 = arith.constant 0 : i32
    %c0_i32_1 = arith.constant 0 : i32
    return %c0_i32, %c0_i32_0 : i32, i32
  }
  func.func @transform_7(%arg0: i32) -> (i32, i32) {
    %c0_i32 = arith.constant 0 : i32
    %c0_i32_0 = arith.constant 0 : i32
    return %arg0, %c0_i32 : i32, i32
  }
  func.func @transform_8(%arg0: i32) -> (i32, i32) {
    %c0_i32 = arith.constant 0 : i32
    %c0_i32_0 = arith.constant 0 : i32
    return %arg0, %c0_i32 : i32, i32
  }
}

</mosaic_0001>

<bundles_post_ra>
// kernel: tpu_custom_call.1
= control target key start
LH: loop header
LB: loop body
LE: loop exit
PB: predicated region body
PF: predicated region fallthrough
CT: control target
= control target key end

     0   :  { %14 = vsyncpa [#allocation3], 0  ;;  %s769_s0 = inlined_call_operand.vmem [shape: bf16[32,128], index: 0, kind: input, shape index: {}]   ;;  %s770_s1 = inlined_call_operand.vmem [shape: bf16[128,32], index: 1, kind: input, shape index: {}]   ;;  %s771_s2 = inlined_call_operand.vmem [shape: f32[1,32], index: 2, kind: input, shape index: {}]   ;;  %s772_s3 = inlined_call_operand.vmem [shape: f32[1,32], index: 3, kind: input, shape index: {}]   ;;  %s773_s4 = inlined_call_operand.vmem [shape: f32[1,32], index: 4, kind: input, shape index: {}]   ;;  %s774_s5 = inlined_call_operand.vmem [shape: bf16[32,32], index: 5, kind: input, shape index: {}]   ;;  %s775_s6 = inlined_call_operand.vmem [shape: bf16[32,32], index: 6, kind: input, shape index: {}]   ;;  %s776_s7 = inlined_call_operand.hbm [shape: bf16[32,32], index: 7, kind: output, shape index: {0}]   ;;  %s777_s8 = inlined_call_operand.hbm [shape: bf16[32,32], index: 8, kind: output, shape index: {1}]  }
   0x1   :  { %v549_v0 = vld [vmem:[%s770_s1] sm:$0xff]   ;;  %v550_v1 = vld [vmem:[%s770_s1 + $0x8] sm:$0xff]   ;;  %v551_v2 = vld [vmem:[%s770_s1 + $0x10] sm:$0xff]  }
   0x2   :  { %509 = vmatprep.subr.bf16.mxu0 %v549_v0  ;;  %v552_v3 = vld [vmem:[%s770_s1 + $0x18] sm:$0xff]   ;;  %v557_v4 = vld [vmem:[%s769_s0] sm:$0xff]  }
   0x3   :  { %510 = vmatpush3.bf16.msra.mxu0 %v549_v0  ;;  %v553_v5 = vld [vmem:[%s770_s1 + $0x20] sm:$0xff]   ;;  %525 = vmatprep.mubr.bf16.mxu0 %v557_v4 }
   0x4   :  { %511 = vmatprep.subr.bf16.mxu0 %v550_v1 }
   0x7   :  { %512 = vmatpush3.bf16.msra.mxu0 %v550_v1 }
   0x8   :  { %513 = vmatprep.subr.bf16.mxu0 %v551_v2 }
   0xb   :  { %514 = vmatpush3.bf16.msra.mxu0 %v551_v2 }
   0xc   :  { %515 = vmatprep.subr.bf16.mxu0 %v552_v3 }
   0xd   :  { %15 = vsyncpa [#allocation5], 0  ;;  %v554_v6 = vld [vmem:[%s770_s1 + $0x28] sm:$0xff]   ;;  %v555_v7 = vld [vmem:[%s770_s1 + $0x30] sm:$0xff]   ;;  %vm167_vm0 = vcmask 261120   ;;  %vm332_vm1 = vcmask 257024  }
   0xe   :  { %v556_v8 = vld [vmem:[%s770_s1 + $0x38] sm:$0xff]   ;;  %v558_v9 = vld [vmem:[%s769_s0 + $0x8] sm:$0xff]   ;;  %v454_v10 = vld [vmem:[%s771_s2] ss:$0 sm:$0xff] }
   0xf   :  { %516 = vmatpush3.bf16.msra.mxu0 %v552_v3  ;;  %v559_v43 = vld [vmem:[%s774_s5] sm:$0xff]   ;;  %v560_v44 = vld [vmem:[%s774_s5 + $0x8] sm:$0xff]  }
  0x10   :  { %517 = vmatprep.subr.bf16.mxu0 %v553_v5  ;;  %529 = vmatprep.subr.bf16.mxu1 %v559_v43  ;;  %v561_v45 = vld [vmem:[%s775_s6] sm:$0xff]  }
  0x11   :  { %530 = vmatpush3.bf16.msra.mxu1 %v559_v43  ;;  %v465_v60 = vld [vmem:[%s772_s3] ss:$0 sm:$0xff] }
  0x12   :  { %531 = vmatprep.subr.bf16.mxu1 %v560_v44  ;;  %v466_v2 = vld [vmem:[%s773_s4] ss:$0 sm:$0xff]  ;;  %s619_s4 = smov [#allocation2]  }
  0x13   :  { %518 = vmatpush3.bf16.msra.mxu0 %v553_v5  ;;  %s427_s12 = sshll.u32 %s619_s4, 4  ;;  %s428_s12 = int_to_ptr.vmem [resolvable:$true] %s427_s12 }
  0x14   :  { %519 = vmatprep.subr.bf16.mxu0 %v554_v6  ;;  %p576_p1 = scmp.lt.s32.totalorder %s428_s12, %s428_s12 }
  0x15   :  { %532 = vmatpush3.bf16.msra.mxu1 %v560_v44 }
  0x16   :  { %537 = vmatprep.subr.bf16.mxu1 %v561_v45 }
  0x17   :  { %520 = vmatpush3.bf16.msra.mxu0 %v554_v6 }
  0x18   :  { %521 = vmatprep.subr.bf16.mxu0 %v555_v7 }
  0x1b   :  { %522 = vmatpush3.bf16.msra.mxu0 %v555_v7 }
  0x1c   :  { %523 = vmatprep.subr.bf16.mxu0 %v556_v8 }
  0x1f   :  { %524 = vmatpush3.bf16.msra.mxu0 %v556_v8 }
  0x22   :  { %526 = vmatmul.mubr.bf16.vlgmr.msra.gmra.mrb[0].mxu0 %v558_v9 }
  0xf5   :  { %v527_v11 = vpop.f32.mrb[0].mxu0 }
  0xf6   :  { %v161_v12 = vadd.f32 %v527_v11, %v454_v10  ;;  %v152_v13 = vpop.f32.mrb[1].mxu0 }
  0xf7   :  { %v153_v14 = vadd.f32 %v454_v10, %v152_v13  ;;  %v528_v15 = vpop.f32.mrb[2].mxu0 }
  0xf8   :  { %v164_v16 = vadd.f32 %v528_v15, %v454_v10  ;;  %v155_v17 = vpop.f32.mrb[3].mxu0  ;;  %v174_v18 = vsel %vm167_vm0, %v161_v12, 0.0 }
  0xf9   :  { %v156_v19 = vadd.f32 %v454_v10, %v155_v17  ;;  %175 = vadd.xlane.f32.xlu1 %v174_v18  ;;  %v168_v20 = vsel %vm167_vm0, %v153_v14, 0.0 }
  0xfa   :  { %169 = vadd.xlane.f32.xlu0 %v168_v20  ;;  %v177_v21 = vsel %vm167_vm0, %v164_v16, 0.0 }
  0xfb   :  { %v171_v22 = vsel %vm167_vm0, %v156_v19, 0.0 }
  0xfd   :  { %178 = vadd.xlane.f32.xlu1 %v177_v21 }
  0xfe   :  { %172 = vadd.xlane.f32.xlu0 %v171_v22 }
 0x186   :  { %v176_v23 = vpop.xlane.xlu1 %175 }
 0x187   :  { %v183_v24 = vmul.f32 0.03125, %v176_v23  ;;  %v170_v25 = vpop.xlane.xlu0 %169 }
 0x188   :  { %v181_v26 = vmul.f32 0.03125, %v170_v25 }
 0x189   :  { %v187_v27 = vsub.f32 %v161_v12, %v183_v24 }
 0x18a   :  { %v185_v28 = vsub.f32 %v153_v14, %v181_v26  ;;  %v179_v29 = vpop.xlane.xlu1 %178  ;;  %v562_v14 = vld [vmem:[%s775_s6 + $0x8] sm:$0xff]   ;;  %s571_s6 = scalar_lea.vmem %s428_s12, 256 }
 0x18b   :  { %v184_v30 = vmul.f32 0.03125, %v179_v29  ;;  %v173_v31 = vpop.xlane.xlu0 %172  ;;  %v191_v37 = vmul.f32 %v187_v27, %v187_v27  ;;  %p572_p0 = scmp.ne.s32.totalorder %s428_s12, %s571_s6  ;;  %p577_p2 = scmp.lt.s32.totalorder %s571_s6, %s571_s6 }
 0x18c   :  { %v182_v32 = vmul.f32 0.03125, %v173_v31  ;;  %v189_v33 = vmul.f32 %v185_v28, %v185_v28 }
 0x18d   :  { %v188_v34 = vsub.f32 %v164_v16, %v184_v30  ;;  %v199_v39 = vsel %vm167_vm0, %v191_v37, 0.0  ;;  %p578_p3 = por %p577_p2, %p576_p1 }
 0x18e   :  { %v186_v35 = vsub.f32 %v156_v19, %v182_v32  ;;  %v193_v36 = vsel %vm167_vm0, %v189_v33, 0.0 }
 0x18f   :  { %194 = vadd.xlane.f32.xlu0 %v193_v36  ;;  %v192_v41 = vmul.f32 %v188_v34, %v188_v34  ;;  %p579_p4 = pnand %p578_p3, %p572_p0 }
 0x190   :  { %v190_v38 = vmul.f32 %v186_v35, %v186_v35 }
 0x191   :  { %v202_v42 = vsel %vm167_vm0, %v192_v41, 0.0 }
 0x192   :  { %v196_v40 = vsel %vm167_vm0, %v190_v38, 0.0 }
 0x193   :  { %200 = vadd.xlane.f32.xlu0 %v199_v39  ;;  %197 = vadd.xlane.f32.xlu1 %v196_v40 }
 0x197   :  { %203 = vadd.xlane.f32.xlu1 %v202_v42 }
 0x21c   :  { %v195_v46 = vpop.xlane.xlu0 %194 }
 0x21d   :  { %v205_v47 = vmul.f32 0.03125, %v195_v46 }
 0x21f   :  { %v209_v48 = vadd.f32 1e-05, %v205_v47 }
 0x220   :  { %v198_v49 = vpop.xlane.xlu1 %197  ;;  %v201_v50 = vpop.xlane.xlu0 %200 }
 0x221   :  { %563 = vrsqrt.f32 %v209_v48  ;;  %v206_v51 = vmul.f32 0.03125, %v198_v49  ;;  %v207_v52 = vmul.f32 0.03125, %v201_v50 }
 0x223   :  { %v210_v53 = vadd.f32 1e-05, %v206_v51  ;;  %v211_v54 = vadd.f32 1e-05, %v207_v52 }
 0x224   :  { %v204_v55 = vpop.xlane.xlu1 %203 }
 0x225   :  { %565 = vrsqrt.f32 %v210_v53  ;;  %v208_v56 = vmul.f32 0.03125, %v204_v55 }
 0x226   :  { %567 = vrsqrt.f32 %v211_v54 }
 0x227   :  { %v212_v57 = vadd.f32 1e-05, %v208_v56 }
 0x229   :  { %569 = vrsqrt.f32 %v212_v57 }
 0x22b   :  { %v564_v58 = vpop.eup %563 }
 0x22c   :  { %v217_v59 = vmul.f32 %v564_v58, %v185_v28 }
 0x22e   :  { %v228_v0 = vmul.f32 %v465_v60, %v217_v59 }
 0x22f   :  { %v566_v61 = vpop.eup %565 }
 0x230   :  { %v568_v62 = vpop.eup %567  ;;  %v218_v63 = vmul.f32 %v566_v61, %v186_v35  ;;  %v239_v6 = vadd.f32 %v466_v2, %v228_v0 }
 0x231   :  { %v219_v1 = vmul.f32 %v568_v62, %v187_v27 }
 0x232   :  { %v229_v3 = vmul.f32 %v465_v60, %v218_v63 }
 0x233   :  { %v570_v4 = vpop.eup %569  ;;  %v230_v8 = vmul.f32 %v465_v60, %v219_v1 }
 0x234   :  { %v220_v5 = vmul.f32 %v570_v4, %v188_v34  ;;  %v240_v7 = vadd.f32 %v466_v2, %v229_v3 }
 0x235   :  { %v241_v11 = vadd.f32 %v466_v2, %v230_v8 }
 0x236   :  { %v243_v9 = vpack.c.bf16 %v240_v7, %v239_v6  ;;  %v231_v10 = vmul.f32 %v465_v60, %v220_v5 }
 0x238   :  { %533 = vmatprep.mubr.msk.bf16.mxu1 %vm167_vm0, %v243_v9  ;;  %v242_v12 = vadd.f32 %v466_v2, %v231_v10 }
 0x23a   :  { %v244_v13 = vpack.c.bf16 %v242_v12, %v241_v11 }
 0x23c   :  { %534 = vmatmul.mubr.msk.bf16.vlgmr.msra.gmra.mrb[0].mxu1 %vm167_vm0, %v244_v13 }
 0x23d   :  { %538 = vmatpush3.bf16.msra.mxu1 %v561_v45  ;;  %541 = vmatprep.mubr.msk.bf16.mxu1 %vm167_vm0, %v243_v9 }
 0x23e   :  { %539 = vmatprep.subr.bf16.mxu1 %v562_v14 }
 0x241   :  { %540 = vmatpush3.bf16.msra.mxu1 %v562_v14 }
 0x244   :  { %542 = vmatmul.mubr.msk.bf16.vlgmr.msra.gmra.mrb[4].mxu1 %vm167_vm0, %v244_v13 }
 0x30f   :  { %v535_v15 = vpop.f32.mrb[0].mxu1 }
 0x310   :  { %v485_v16 = vpack.c.bf16 %v535_v15, %v535_v15  ;;  %v301_v17 = vpop.f32.mrb[1].mxu1 }
 0x311   :  { %v483_v18 = vpack.c.bf16 %v301_v17, %v301_v17  ;;  %v536_v19 = vpop.f32.mrb[2].mxu1 }
 0x312   :  { %335 = vst.msk [vmem:[#allocation2 + $0x8] sm:$0xf] %vm332_vm1, %v485_v16  ;;  %v486_v20 = vpack.c.bf16 %v536_v19, %v536_v19  ;;  %v304_v21 = vpop.f32.mrb[3].mxu1 }
 0x313   :  { %333 = vst.msk [vmem:[#allocation2] sm:$0xf] %vm332_vm1, %v483_v18  ;;  %v484_v22 = vpack.c.bf16 %v304_v21, %v304_v21 }
 0x314   :  { %336 = vst.msk [vmem:[#allocation2 + $0xc] sm:$0xf] %vm332_vm1, %v486_v20 }
 0x315   :  { %334 = vst.msk [vmem:[#allocation2 + $0x4] sm:$0xf] %vm332_vm1, %v484_v22 }
 0x316   :  { %582 = shalt.err (!%p579_p4)
}
 0x317   :  { %s583_s15 = scalar_lea.hbm %s776_s7, 256 }
 0x318   :  { %p584_p5 = scmp.ne.s32.totalorder %s776_s7, %s583_s15  ;;  %p587_p6 = scmp.lt.u32.totalorder %s583_s15, %s776_s7 }
 0x31a   :  { %p589_p7 = pnand %p587_p6, %p584_p5 }
 0x31c   :  { %592 = shalt.err (!%p589_p7)
}
 0x31d   :  { %s620_s20 = smov 64   ;;  %s621_s21 = smov 4   ;;  %v543_v23 = vpop.f32.mrb[4].mxu1 }
 0x31e   :  { %433 = dma.vmem_to_hbm [thread:$0]  %s428_s12, 256, %s776_s7, [#allocation3], %s620_s20, %s620_s20, %s621_s21   ;;  %v489_v24 = vpack.c.bf16 %v543_v23, %v543_v23  ;;  %v387_v25 = vpop.f32.mrb[5].mxu1 }
 0x31f   :  { %s622_s24 = smov [#allocation4]   ;;  %v487_v26 = vpack.c.bf16 %v387_v25, %v387_v25  ;;  %v544_v27 = vpop.f32.mrb[6].mxu1 }
 0x320   :  { %s439_s25 = sshll.u32 %s622_s24, 4  ;;  %420 = vst.msk [vmem:[#allocation4 + $0x8] sm:$0xf] %vm332_vm1, %v489_v24  ;;  %v490_v28 = vpack.c.bf16 %v544_v27, %v544_v27  ;;  %v390_v29 = vpop.f32.mrb[7].mxu1  ;;  %s440_s25 = int_to_ptr.vmem [resolvable:$true] %s439_s25 }
 0x321   :  { %418 = vst.msk [vmem:[#allocation4] sm:$0xf] %vm332_vm1, %v487_v26  ;;  %v488_v30 = vpack.c.bf16 %v390_v29, %v390_v29  ;;  %s593_s7 = scalar_lea.vmem %s440_s25, 256  ;;  %p598_p9 = scmp.lt.s32.totalorder %s440_s25, %s440_s25 }
 0x322   :  { %421 = vst.msk [vmem:[#allocation4 + $0xc] sm:$0xf] %vm332_vm1, %v490_v28  ;;  %p594_p8 = scmp.ne.s32.totalorder %s440_s25, %s593_s7  ;;  %p599_p10 = scmp.lt.s32.totalorder %s593_s7, %s593_s7 }
 0x323   :  { %419 = vst.msk [vmem:[#allocation4 + $0x4] sm:$0xf] %vm332_vm1, %v488_v30 }
 0x324   :  { %p600_p11 = por %p599_p10, %p598_p9 }
 0x326   :  { %p601_p12 = pnand %p600_p11, %p594_p8 }
 0x328   :  { %604 = shalt.err (!%p601_p12)
}
 0x329   :  { %s605_s1 = scalar_lea.hbm %s777_s8, 256 }
 0x32a   :  { %p606_p13 = scmp.ne.s32.totalorder %s777_s8, %s605_s1  ;;  %p609_p0 = scmp.lt.u32.totalorder %s605_s1, %s777_s8 }
 0x32c   :  { %p611_p1 = pnand %p609_p0, %p606_p13 }
 0x32e   :  { %614 = shalt.err (!%p611_p1)
}
 0x32f   :  { %445 = dma.vmem_to_hbm [thread:$0]  %s440_s25, 256, %s777_s8, [#allocation5], %s620_s20, %s620_s20, %s621_s21  }
 0x330   :  { %615 = dma.done.wait [#allocation3], 256  }
 0x331   :  { %616 = vsyncadd [#allocation3], 4294967040 }
 0x332   :  { %617 = dma.done.wait [#allocation5], 256  }
 0x333   :  { %618 = vsyncadd [#allocation5], 4294967040 }
 0x334   :  { %452 = vsyncpa [#allocation3], 1 }
 0x335   :  { %453 = vsyncpa [#allocation5], 1 }

</bundles_post_ra>
